<compile_context>
chip_gen: v5e
topology: v5e:2x2
jax: 0.10.0
libtpu: 0.0.40
codegen_flags: <defaults>
</compile_context>

<pallas_src>
import functools

import jax
import jax.numpy as jnp
from jax.experimental import pallas as pl
from jax.experimental.pallas import tpu as pltpu

IN_F = 2
HSIZE = 16
OUT_F = 2
_GROUP = 8          # sublane-aligned row-group stride for layer-2 packing


def _round_up(n, m):
    return ((n + m - 1) // m) * m


# -----------------------------------------------------------------------------
# Kernel: whole forward pass on one (F, btile) activation tile.
# -----------------------------------------------------------------------------
def _network_kernel(w1t_ref, b1_ref, w2t_ref, b2_ref, xT_ref, outT_ref, *,
                    bf16_tanh):
    xT = xT_ref[...]                                        # (2, btile) f32

    # ---- QuadLayer(2, 16): one fused matmul, bias broadcast-added ----
    z1 = jnp.dot(w1t_ref[...], xT,
                 preferred_element_type=jnp.float32) + b1_ref[...]   # (48, btile)
    pre = z1[:HSIZE] * z1[HSIZE:2 * HSIZE] + z1[2 * HSIZE:3 * HSIZE]  # (16, btile)
    if bf16_tanh:
        # v6e/v7x only: bf16 EUP path ~doubles tanh throughput (slight numerics change).
        h = jnp.tanh(pre.astype(jnp.bfloat16)).astype(jnp.float32)
    else:
        h = jnp.tanh(pre)

    # ---- QuadLayer(16, 2): one fused matmul; row groups are 8-sublane aligned ----
    z2 = jnp.dot(w2t_ref[...], h,
                 preferred_element_type=jnp.float32) + b2_ref[...]   # (24, btile)
    outT_ref[...] = (z2[0:OUT_F]
                     * z2[_GROUP:_GROUP + OUT_F]
                     + z2[2 * _GROUP:2 * _GROUP + OUT_F])             # (2, btile)


# -----------------------------------------------------------------------------
# Kernel-native entry point: (IN_F, B) in -> (OUT_F, B) out (no transposes).
# -----------------------------------------------------------------------------
@functools.partial(jax.jit, static_argnames=("max_btile", "bf16_tanh"))
def network_forward_T(xT, w1t, b1, w2t, b2, *, max_btile=8192, bf16_tanh=False):
    assert max_btile % 128 == 0, "max_btile must be a multiple of 128"
    B = xT.shape[1]

    # >=2 grid steps whenever possible (keeps both v7x TensorCores busy),
    # capped at max_btile lanes per step.
    btile = max(128, min(max_btile, _round_up(-(-B // 2), 128)))
    b_pad = _round_up(B, btile)
    nb = b_pad // btile

    xT = jnp.pad(xT.astype(jnp.float32), ((0, 0), (0, b_pad - B)))

    # ~480 B of VMEM per lane (double-buffered padded in/out tiles + z1/h/z2).
    vmem_est = 480 * btile + (1 << 16)
    vmem_limit = int(min(max(2 * vmem_est, 32 << 20), 48 << 20))

    kernel = functools.partial(_network_kernel, bf16_tanh=bf16_tanh)

    outT = pl.pallas_call(
        kernel,
        out_shape=jax.ShapeDtypeStruct((OUT_F, b_pad), jnp.float32),
        grid_spec=pltpu.PrefetchScalarGridSpec(
            num_scalar_prefetch=0,
            grid=(nb,),
            in_specs=[
                # Tiny resident weight blocks (full arrays, same block every step).
                pl.BlockSpec((3 * HSIZE, IN_F), lambda i: (0, 0)),     # w1t (48, 2)
                pl.BlockSpec((3 * HSIZE, 1), lambda i: (0, 0)),        # b1  (48, 1)
                pl.BlockSpec((3 * _GROUP, HSIZE), lambda i: (0, 0)),   # w2t (24, 16)
                pl.BlockSpec((3 * _GROUP, 1), lambda i: (0, 0)),       # b2  (24, 1)
                # Activations: tiled along the batch/lane axis.
                pl.BlockSpec((IN_F, btile), lambda i: (0, i)),
            ],
            out_specs=pl.BlockSpec((OUT_F, btile), lambda i: (0, i)),
        ),
        compiler_params=pltpu.CompilerParams(
            dimension_semantics=("parallel",),
            vmem_limit_bytes=vmem_limit,
        ),
    )(w1t, b1, w2t, b2, xT)

    return outT[:, :B]


# -----------------------------------------------------------------------------
# Convenience wrapper matching the PyTorch calling convention: (B, 2) -> (B, 2).
# (For max throughput callers should use network_forward_T directly and keep the
#  lane-dense (F, B) layout end-to-end.)
# -----------------------------------------------------------------------------
@functools.partial(jax.jit, static_argnames=("max_btile", "bf16_tanh"))
def network_forward(x, w1t, b1, w2t, b2, *, max_btile=8192, bf16_tanh=False):
    outT = network_forward_T(x.astype(jnp.float32).T, w1t, b1, w2t, b2,
                             max_btile=max_btile, bf16_tanh=bf16_tanh)
    return outT.T


# -----------------------------------------------------------------------------
# Parameter construction (PyTorch nn.Linear layout) + host-side packing.
# -----------------------------------------------------------------------------
def init_raw_params(key):
    """Six (W, b) pairs in PyTorch Linear layout: W (out, in+1), b (out,).

    Order: layer1 [l1, l2, ls], layer2 [l1, l2, ls].
    Init mimics nn.Linear default: uniform +-1/sqrt(fan_in) with fan_in = in+1.
    """
    shapes = [(HSIZE, IN_F + 1)] * 3 + [(OUT_F, HSIZE + 1)] * 3
    keys = jax.random.split(key, 2 * len(shapes))
    raw = []
    for i, (out_f, in_p1) in enumerate(shapes):
        bound = 1.0 / float(in_p1) ** 0.5
        w = jax.random.uniform(keys[2 * i], (out_f, in_p1),
                               minval=-bound, maxval=bound, dtype=jnp.float32)
        b = jax.random.uniform(keys[2 * i + 1], (out_f,),
                               minval=-bound, maxval=bound, dtype=jnp.float32)
        raw.append((w, b))
    return raw


def pack_params(raw):
    """Fuse the three Linears per layer, fold the ones-column into the bias,
    and place layer-2 row groups at 8-sublane-aligned offsets.

    Returns:
      w1t: (48, 2)   fused layer-1 W^T   (rows [0:16]=l1, [16:32]=l2, [32:48]=ls)
      b1:  (48, 1)   fused layer-1 bias_eff = W[:, 2] + b
      w2t: (24, 16)  layer-2 W^T in 8-aligned groups (rows 0:2 / 8:10 / 16:18)
      b2:  (24, 1)   layer-2 bias_eff in the same aligned groups
    """
    w1t = jnp.concatenate([w[:, :IN_F] for (w, _) in raw[:3]], axis=0)
    b1 = jnp.concatenate([w[:, IN_F] + b for (w, b) in raw[:3]], axis=0)[:, None]

    w2t = jnp.zeros((3 * _GROUP, HSIZE), jnp.float32)
    b2 = jnp.zeros((3 * _GROUP, 1), jnp.float32)
    for g, (w, b) in enumerate(raw[3:]):
        w2t = w2t.at[g * _GROUP:g * _GROUP + OUT_F, :].set(w[:, :HSIZE])
        b2 = b2.at[g * _GROUP:g * _GROUP + OUT_F, 0].set(w[:, HSIZE] + b)
    return w1t, b1, w2t, b2


# -----------------------------------------------------------------------------
# Pure-JAX reference (mirrors the PyTorch module exactly).
# -----------------------------------------------------------------------------
def network_ref(x, raw):
    def lin(h, w, b):
        return h @ w.T + b

    def quad(h, trio):
        hp = jnp.concatenate([h, jnp.ones((h.shape[0], 1), h.dtype)], axis=-1)
        (w1, b1), (w2, b2), (ws, bs) = trio
        return lin(hp, w1, b1) * lin(hp, w2, b2) + lin(hp, ws, bs)

    h = quad(x, raw[:3])
    h = jnp.tanh(h)
    return quad(h, raw[3:])


if __name__ == "__main__":
    key = jax.random.PRNGKey(0)
    k_x, k_x2, k_x3, k_p = jax.random.split(key, 4)

    raw = init_raw_params(k_p)
    params = pack_params(raw)

    # Small batch (single tile).
    B = 8
    x = jax.random.normal(k_x, (B, IN_F), dtype=jnp.float32)
    out = jax.block_until_ready(network_forward(x, *params))
    ref = network_ref(x, raw)
    assert out.shape == (B, OUT_F), out.shape
    assert jnp.allclose(out, ref, atol=1e-5, rtol=1e-5)

    # Non-multiple-of-tile batch -> exercises grid (2 steps) + lane padding.
    B2 = 300
    x2 = jax.random.normal(k_x2, (B2, IN_F), dtype=jnp.float32)
    out2 = jax.block_until_ready(network_forward(x2, *params))
    ref2 = network_ref(x2, raw)
    assert out2.shape == (B2, OUT_F), out2.shape
    assert jnp.allclose(out2, ref2, atol=1e-5, rtol=1e-5)

    # Larger batch through the kernel-native transposed entry point (no wrapper
    # transposes), exercising multi-step pipelining at a bigger tile.
    B3 = 4096
    x3 = jax.random.normal(k_x3, (B3, IN_F), dtype=jnp.float32)
    out3T = jax.block_until_ready(
        network_forward_T(x3.T, *params, max_btile=2048))
    ref3 = network_ref(x3, raw)
    assert out3T.shape == (OUT_F, B3), out3T.shape
    assert jnp.allclose(out3T.T, ref3, atol=1e-5, rtol=1e-5)

    print("KERNEL_OK")
</pallas_src>

<mosaic_0001>
module attributes {stable_mosaic.version = 11 : i64} {
  func.func @_network_kernel(%arg0: i32, %arg1: memref<48x2xf32, #tpu.memory_space<vmem>>, %arg2: memref<48x1xf32, #tpu.memory_space<vmem>>, %arg3: memref<24x16xf32, #tpu.memory_space<vmem>>, %arg4: memref<24x1xf32, #tpu.memory_space<vmem>>, %arg5: memref<2x128xf32, #tpu.memory_space<vmem>>, %arg6: memref<2x128xf32, #tpu.memory_space<vmem>>) attributes {dimension_semantics = [#tpu.dimension_semantics<parallel>], iteration_bounds = array<i64: 1>, scalar_prefetch = 0 : i64, scratch_operands = 0 : i64, tpu.core_type = #tpu.core_type<tc>, window_params = [{pipeline_mode = #tpu.pipeline_mode<synchronous>, transform_indices = @transform_0, window_bounds = array<i64: 48, 2>}, {pipeline_mode = #tpu.pipeline_mode<synchronous>, transform_indices = @transform_1, window_bounds = array<i64: 48, 1>}, {pipeline_mode = #tpu.pipeline_mode<synchronous>, transform_indices = @transform_2, window_bounds = array<i64: 24, 16>}, {pipeline_mode = #tpu.pipeline_mode<synchronous>, transform_indices = @transform_3, window_bounds = array<i64: 24, 1>}, {transform_indices = @transform_4, window_bounds = array<i64: 2, 128>}, {transform_indices = @transform_5, window_bounds = array<i64: 2, 128>}]} {
    %c0 = arith.constant 0 : index
    %c0_0 = arith.constant 0 : index
    %0 = vector.load %arg5[%c0, %c0_0] : memref<2x128xf32, #tpu.memory_space<vmem>>, vector<2x128xf32>
    %c0_1 = arith.constant 0 : index
    %c0_2 = arith.constant 0 : index
    %1 = vector.load %arg1[%c0_1, %c0_2] : memref<48x2xf32, #tpu.memory_space<vmem>>, vector<48x2xf32>
    %cst = arith.constant dense<0.000000e+00> : vector<48x128xf32>
    %2 = tpu.matmul %1, %0, %cst {dimension_numbers = #tpu.dot_dimension_numbers<[1], [0], [0], [1], [0, 0, 1, 1], [], []>} : vector<48x2xf32>, vector<2x128xf32>, vector<48x128xf32> -> vector<48x128xf32>
    %c0_3 = arith.constant 0 : index
    %c0_4 = arith.constant 0 : index
    %3 = vector.load %arg2[%c0_3, %c0_4] : memref<48x1xf32, #tpu.memory_space<vmem>>, vector<48x1xf32>
    %4 = vector.broadcast %3 : vector<48x1xf32> to vector<48x128xf32>
    %5 = arith.addf %2, %4 : vector<48x128xf32>
    %6 = vector.extract_strided_slice %5 {offsets = [0, 0], sizes = [16, 128], strides = [1, 1]} : vector<48x128xf32> to vector<16x128xf32>
    %7 = vector.extract_strided_slice %5 {offsets = [16, 0], sizes = [16, 128], strides = [1, 1]} : vector<48x128xf32> to vector<16x128xf32>
    %8 = arith.mulf %6, %7 : vector<16x128xf32>
    %9 = vector.extract_strided_slice %5 {offsets = [32, 0], sizes = [16, 128], strides = [1, 1]} : vector<48x128xf32> to vector<16x128xf32>
    %10 = arith.addf %8, %9 : vector<16x128xf32>
    %11 = math.tanh %10 : vector<16x128xf32>
    %c0_5 = arith.constant 0 : index
    %c0_6 = arith.constant 0 : index
    %12 = vector.load %arg3[%c0_5, %c0_6] : memref<24x16xf32, #tpu.memory_space<vmem>>, vector<24x16xf32>
    %cst_7 = arith.constant dense<0.000000e+00> : vector<24x128xf32>
    %13 = tpu.matmul %12, %11, %cst_7 {dimension_numbers = #tpu.dot_dimension_numbers<[1], [0], [0], [1], [0, 0, 1, 1], [], []>} : vector<24x16xf32>, vector<16x128xf32>, vector<24x128xf32> -> vector<24x128xf32>
    %c0_8 = arith.constant 0 : index
    %c0_9 = arith.constant 0 : index
    %14 = vector.load %arg4[%c0_8, %c0_9] : memref<24x1xf32, #tpu.memory_space<vmem>>, vector<24x1xf32>
    %15 = vector.broadcast %14 : vector<24x1xf32> to vector<24x128xf32>
    %16 = arith.addf %13, %15 : vector<24x128xf32>
    %17 = vector.extract_strided_slice %16 {offsets = [0, 0], sizes = [2, 128], strides = [1, 1]} : vector<24x128xf32> to vector<2x128xf32>
    %18 = vector.extract_strided_slice %16 {offsets = [8, 0], sizes = [2, 128], strides = [1, 1]} : vector<24x128xf32> to vector<2x128xf32>
    %19 = arith.mulf %17, %18 : vector<2x128xf32>
    %20 = vector.extract_strided_slice %16 {offsets = [16, 0], sizes = [2, 128], strides = [1, 1]} : vector<24x128xf32> to vector<2x128xf32>
    %21 = arith.addf %19, %20 : vector<2x128xf32>
    %c0_10 = arith.constant 0 : index
    %c0_11 = arith.constant 0 : index
    %22 = vector.load %arg6[%c0_10, %c0_11] : memref<2x128xf32, #tpu.memory_space<vmem>>, vector<2x128xf32>
    tpu.vector_store %arg6[%c0_10, %c0_11], %21 {strides = array<i32>} : memref<2x128xf32, #tpu.memory_space<vmem>>, vector<2x128xf32>,
    return
  }
  func.func @transform_0(%arg0: i32) -> (i32, i32) {
    %c0_i32 = arith.constant 0 : i32
    %c0_i32_0 = arith.constant 0 : i32
    %c0_i32_1 = arith.constant 0 : i32
    return %c0_i32, %c0_i32_0 : i32, i32
  }
  func.func @transform_1(%arg0: i32) -> (i32, i32) {
    %c0_i32 = arith.constant 0 : i32
    %c0_i32_0 = arith.constant 0 : i32
    %c0_i32_1 = arith.constant 0 : i32
    return %c0_i32, %c0_i32_0 : i32, i32
  }
  func.func @transform_2(%arg0: i32) -> (i32, i32) {
    %c0_i32 = arith.constant 0 : i32
    %c0_i32_0 = arith.constant 0 : i32
    %c0_i32_1 = arith.constant 0 : i32
    return %c0_i32, %c0_i32_0 : i32, i32
  }
  func.func @transform_3(%arg0: i32) -> (i32, i32) {
    %c0_i32 = arith.constant 0 : i32
    %c0_i32_0 = arith.constant 0 : i32
    %c0_i32_1 = arith.constant 0 : i32
    return %c0_i32, %c0_i32_0 : i32, i32
  }
  func.func @transform_4(%arg0: i32) -> (i32, i32) {
    %c0_i32 = arith.constant 0 : i32
    %c0_i32_0 = arith.constant 0 : i32
    return %c0_i32, %arg0 : i32, i32
  }
  func.func @transform_5(%arg0: i32) -> (i32, i32) {
    %c0_i32 = arith.constant 0 : i32
    %c0_i32_0 = arith.constant 0 : i32
    return %c0_i32, %arg0 : i32, i32
  }
}

</mosaic_0001>

<bundles_post_ra>
// kernel: network_forward_T.1
= control target key start
LH: loop header
LB: loop body
LE: loop exit
PB: predicated region body
PF: predicated region fallthrough
CT: control target
= control target key end

     0   :  { %vm83_vm0 = vcmask 1041408   ;;  %vm64_vm1 = vcmask 15360   ;;  %v252_v5 = vmov 0   ;;  %s350_s0 = inlined_call_operand.vmem [shape: f32[48,2], index: 0, kind: input, shape index: {}]   ;;  %s351_s1 = inlined_call_operand.vmem [shape: f32[48,1], index: 1, kind: input, shape index: {}]   ;;  %s352_s2 = inlined_call_operand.vmem [shape: f32[24,16], index: 2, kind: input, shape index: {}]   ;;  %s353_s3 = inlined_call_operand.vmem [shape: f32[24,1], index: 3, kind: input, shape index: {}]   ;;  %s354_s4 = inlined_call_operand.vmem [shape: f32[2,128], index: 4, kind: input, shape index: {}]   ;;  %s355_s5 = inlined_call_operand.hbm [shape: f32[2,128], index: 5, kind: output, shape index: {}]  }
   0x1   :  { %v21_v0 = vld [vmem:[%s354_s4] sm:$0x3]  ;;  %v25_v2 = vld [vmem:[%s350_s0 + $0x18] sm:$0xff]  ;;  %v29_v3 = vld [vmem:[%s351_s1 + $0x8] sm:$0xff]  ;;  %219 = vset.pattern.permute.xlu0 %v252_v5  ;;  %220 = vset.pattern.permute.xlu1 %v252_v5 }
   0x2   :  { %v22_v1 = vld [vmem:[%s350_s0] sm:$0xff]  ;;  %204 = vmatpush.msk.msra.mxu0 %vm83_vm0, %v21_v0  ;;  %214 = vmatpush.msk.msra.mxu2 %vm83_vm0, %v21_v0  ;;  %v33_v6 = vld [vmem:[%s351_s1 + $0x28] sm:$0xff] }
   0x3   :  { %205 = vmatmul.msk.f32.vlgmr.msra.gmra.mxu0 %vm64_vm1, %v22_v1  ;;  %208 = vmatmul.msk.f32.vlgmr.msra.gmra.mxu2 %vm64_vm1, %v25_v2  ;;  %v28_v4 = vld [vmem:[%s351_s1] sm:$0xff] }
   0x4   :  { %41 = vperm.xlu0 %219, %v29_v3   ;;  %36 = vperm.xlu1 %220, %v28_v4  }
   0x5   :  { %221 = vset.pattern.permute.xlu2 %v252_v5 }
   0x6   :  { %10 = vsyncpa [#allocation3], 0  ;;  %61 = vperm.xlu2 %221, %v33_v6   ;;  %v23_v7 = vld [vmem:[%s350_s0 + $0x8] sm:$0xff]  ;;  %v26_v8 = vld [vmem:[%s350_s0 + $0x20] sm:$0xff]  ;;  %vm149_vm2 = vcmask 130048   ;;  %s253_s26 = smov [#allocation2]  }
   0x7   :  { %v31_v9 = vld [vmem:[%s351_s1 + $0x18] sm:$0xff]  ;;  %v30_v10 = vld [vmem:[%s351_s1 + $0x10] sm:$0xff]  ;;  %v32_v11 = vld [vmem:[%s351_s1 + $0x20] sm:$0xff]  ;;  %s193_s27 = sshll.u32 %s253_s26, 4  ;;  %s195_s30 = sshll.u32 %s355_s5, 4  ;;  %s194_s27 = int_to_ptr.vmem [resolvable:$true] %s193_s27  ;;  %s196_s30 = int_to_ptr.hbm [resolvable:$true] %s195_s30 }
   0x8   :  { %v24_v12 = vld [vmem:[%s350_s0 + $0x10] sm:$0xff]  ;;  %v27_v13 = vld [vmem:[%s350_s0 + $0x28] sm:$0xff]  ;;  %v131_v14 = vld [vmem:[%s353_s3] sm:$0xff] }
   0x9   :  { %v132_v15 = vld [vmem:[%s353_s3 + $0x8] sm:$0xff]  ;;  %v133_v16 = vld [vmem:[%s353_s3 + $0x10] sm:$0xff]  ;;  %v128_v40 = vld [vmem:[%s352_s2] sm:$0xff] }
   0xa   :  { %v129_v41 = vld [vmem:[%s352_s2 + $0x8] sm:$0xff]  ;;  %v130_v43 = vld [vmem:[%s352_s2 + $0x10] sm:$0xff] }
   0xb   :  { %206 = vmatmul.msk.f32.gmra.mxu0 %vm64_vm1, %v23_v7  ;;  %209 = vmatmul.msk.f32.gmra.mxu2 %vm64_vm1, %v26_v8 }
   0xc   :  { %51 = vperm.xlu0 %219, %v31_v9   ;;  %46 = vperm.xlu1 %220, %v30_v10  }
   0xe   :  { %56 = vperm.xlu2 %221, %v32_v11  }
  0x13   :  { %207 = vmatmul.msk.f32.gmra.mxu0 %vm64_vm1, %v24_v12  ;;  %210 = vmatmul.msk.f32.gmra.mxu2 %vm64_vm1, %v27_v13 }
  0x14   :  { %136 = vperm.xlu0 %219, %v131_v14   ;;  %141 = vperm.xlu1 %220, %v132_v15  }
  0x16   :  { %146 = vperm.xlu2 %221, %v133_v16  }
  0x60   :  { %v62_v22 = vpop.permute.xlu2 %61 }
  0x68   :  { %v57_v32 = vpop.permute.xlu2 %56 }
  0x70   :  { %v147_v50 = vpop.permute.xlu2 %146 }
  0x76   :  { %v37_v18 = vpop.permute.xlu1 %36  ;;  %v42_v21 = vpop.permute.xlu0 %41 }
  0x7e   :  { %v47_v24 = vpop.permute.xlu1 %46  ;;  %v52_v29 = vpop.permute.xlu0 %51 }
  0x80   :  { %v104_v17 = vpop.f32.mrf.mxu0 }
  0x81   :  { %v105_v27 = vadd.f32 %v104_v17, %v37_v18 }
  0x86   :  { %v113_v19 = vpop.f32.mrf.mxu2  ;;  %v142_v45 = vpop.permute.xlu1 %141 }
  0x87   :  { %v114_v30 = vadd.f32 %v113_v19, %v52_v29  ;;  %v137_v48 = vpop.permute.xlu0 %136 }
  0x88   :  { %v107_v20 = vpop.f32.mrf.mxu0 }
  0x89   :  { %v108_v28 = vadd.f32 %v107_v20, %v42_v21 }
  0x8b   :  { %v123_v34 = vmul.f32 %v114_v30, %v108_v28 }
  0x8e   :  { %v116_v23 = vpop.f32.mrf.mxu2 }
  0x8f   :  { %v117_v35 = vadd.f32 %v116_v23, %v57_v32 }
  0x90   :  { %v110_v25 = vpop.f32.mrf.mxu0 }
  0x91   :  { %v111_v26 = vadd.f32 %v110_v25, %v47_v24 }
  0x93   :  { %v122_v31 = vmul.f32 %v111_v26, %v105_v27 }
  0x95   :  { %v124_v37 = vadd.f32 %v122_v31, %v117_v35 }
  0x96   :  { %v119_v33 = vpop.f32.mrf.mxu2 }
  0x97   :  { %v120_v36 = vadd.f32 %v119_v33, %v62_v22 }
  0x99   :  { %v125_v38 = vadd.f32 %v123_v34, %v120_v36 }
  0x9b   :  { %222 = vtanh.f32 %v125_v38 }
  0x9c   :  { %224 = vtanh.f32 %v124_v37 }
  0xa1   :  { %v223_v39 = vpop.eup %222 }
  0xa2   :  { %173 = vmatpush.msra.mxu1 %v223_v39  ;;  %215 = vmatpush.msra.mxu3 %v223_v39  ;;  %v225_v42 = vpop.eup %224 }
  0xa4   :  { %174 = vmatpush.msra.mxu1 %v225_v42  ;;  %216 = vmatpush.msra.mxu3 %v225_v42 }
  0xa5   :  { %211 = vmatmul.msk.f32.vlgmr.msra.gmra.mxu1 %vm149_vm2, %v128_v40  ;;  %212 = vmatmul.msk.f32.vlgmr.msra.gmra.mxu3 %vm149_vm2, %v129_v41 }
  0xad   :  { %213 = vmatmul.msk.f32.gmra.mxu3 %vm149_vm2, %v130_v43 }
 0x122   :  { %v176_v46 = vpop.f32.mrf.mxu1 }
 0x123   :  { %v177_v49 = vadd.f32 %v176_v46, %v137_v48 }
 0x128   :  { %v179_v44 = vpop.f32.mrf.mxu3 }
 0x129   :  { %v180_v47 = vadd.f32 %v179_v44, %v142_v45 }
 0x12b   :  { %v185_v52 = vmul.f32 %v180_v47, %v177_v49 }
 0x130   :  { %v182_v51 = vpop.f32.mrf.mxu3 }
 0x131   :  { %v183_v53 = vadd.f32 %v182_v51, %v147_v50 }
 0x133   :  { %v186_v54 = vadd.f32 %v185_v52, %v183_v53 }
 0x135   :  { %187 = vst [vmem:[#allocation2] sm:$0x3] %v186_v54 }
 0x136   :  { %198 = dma.vmem_to_hbm [thread:$0]  %s194_s27, 32, %s196_s30, [#allocation3]  }
 0x137   :  { %250 = dma.done.wait [#allocation3], 32  }
 0x138   :  { %251 = vsyncadd [#allocation3], 4294967264 }
 0x139   :  { %203 = vsyncpa [#allocation3], 1 }

</bundles_post_ra>
